<compile_context>
chip_gen: v7x
topology: tpu7x:2x2x1
jax: 0.10.0
libtpu: 0.0.40
codegen_flags: <defaults>
</compile_context>

<pallas_src>
import functools

import jax
import jax.numpy as jnp
from jax.experimental import pallas as pl
from jax.experimental.pallas import tpu as pltpu


def _conv1x1_kernel(x_ref, w_ref, b_ref, o_ref, *, nb):
    # x_ref: (nb, C_in, TN)   w_ref: (C_out, C_in)   b_ref: (C_out, 1) f32
    # o_ref: (nb, C_out, TN)
    w = w_ref[...]
    b = b_ref[...]
    for bi in range(nb):  # static unroll over the images packed into this block
        acc = jnp.dot(w, x_ref[bi], preferred_element_type=jnp.float32)
        o_ref[bi] = (acc + b).astype(o_ref.dtype)


def _round_up(v, m):
    return -(-v // m) * m


def _select_tiling(n, c_in, c_out, hw, itemsize, *, vmem_budget, max_lane_tile):
    """Pick (nb, tn) so double-buffered x+out tiles fit in `vmem_budget` bytes."""
    # Sublane padding of the (small) channel axes inside VMEM tiles.
    sub = 8 * max(1, 4 // itemsize)
    c_in_p = _round_up(c_in, sub)
    c_out_p = _round_up(c_out, sub)
    # Double-buffered (x tile + out tile) bytes per lane column, per image.
    bytes_per_lane = 2 * (c_in_p + c_out_p) * itemsize

    tn_cap = (vmem_budget // bytes_per_lane) // 128 * 128
    tn_cap = max(128, min(tn_cap, max_lane_tile))

    if hw <= tn_cap:
        # Whole image fits in one lane tile: pack multiple images per step.
        tn = hw
        nb = max(1, vmem_budget // max(bytes_per_lane * tn, 1))
        nb = min(nb, n)
        if n >= 2:                      # keep >= 2 grid steps for v7x's 2 TCs
            nb = min(nb, max(1, n // 2))
        while nb > 1 and n % nb:        # avoid a ragged trailing batch block
            nb -= 1
    else:
        # Tile over H*W; choose tn to divide hw as evenly as possible.
        nb = 1
        n_tiles = -(-hw // tn_cap)
        tn = min(_round_up(-(-hw // n_tiles), 128), tn_cap)

    vmem_needed = bytes_per_lane * nb * tn + 2 * c_out_p * (c_in_p + 128) * 4
    return nb, tn, vmem_needed


@jax.jit
def conv1x1(x_nchw, weight, bias):
    """1x1 conv (nn.Conv2d kernel_size=1).

    x_nchw: (N, C_in, H, W); weight: (C_out, C_in[,1,1]); bias: (C_out,).
    """
    n, c_in, h, w = x_nchw.shape
    c_out = weight.shape[0]
    hw = h * w

    # Free reshapes: no transposes, no extra HBM passes in the wrapper.
    x3 = x_nchw.reshape(n, c_in, hw)                    # (N, C_in, H*W)
    w2 = weight.reshape(c_out, c_in).astype(x3.dtype)   # matmul operand in x dtype
    b2 = bias.reshape(c_out, 1).astype(jnp.float32)     # bias stays f32 (added to f32 acc)

    itemsize = jnp.dtype(x3.dtype).itemsize
    nb, tn, vmem_needed = _select_tiling(
        n, c_in, c_out, hw, itemsize,
        vmem_budget=8 * 1024 * 1024,   # double-buffered footprint target (safe on v5e/v6e/v7x)
        max_lane_tile=32768)

    grid = (pl.cdiv(n, nb), pl.cdiv(hw, tn))

    cost = pl.CostEstimate(
        flops=2 * n * hw * c_in * c_out,
        transcendentals=0,
        bytes_accessed=(x3.size + n * c_out * hw) * itemsize
        + w2.size * itemsize + b2.size * 4,
    )

    vmem_limit = int(min(32 << 20, max(16 << 20, 2 * vmem_needed + (2 << 20))))

    out3 = pl.pallas_call(
        functools.partial(_conv1x1_kernel, nb=nb),
        out_shape=jax.ShapeDtypeStruct((n, c_out, hw), x3.dtype),
        grid_spec=pltpu.PrefetchScalarGridSpec(
            num_scalar_prefetch=0,
            grid=grid,
            in_specs=[
                pl.BlockSpec((nb, c_in, tn), lambda ni, ji: (ni, 0, ji)),
                pl.BlockSpec((c_out, c_in), lambda ni, ji: (0, 0)),
                pl.BlockSpec((c_out, 1), lambda ni, ji: (0, 0)),
            ],
            out_specs=pl.BlockSpec((nb, c_out, tn), lambda ni, ji: (ni, 0, ji)),
        ),
        compiler_params=pltpu.CompilerParams(
            dimension_semantics=("parallel", "parallel"),
            vmem_limit_bytes=vmem_limit,
        ),
        cost_estimate=cost,
    )(x3, w2, b2)

    # Free reshape back to NCHW.
    return out3.reshape(n, c_out, h, w)


if __name__ == "__main__":
    # Small shapes consistent with the module's forward: batch=2, in=4, out=8, 16x16.
    N, C_IN, C_OUT, H, W = 2, 4, 8, 16, 16

    key = jax.random.PRNGKey(0)
    k_x, k_w, k_b = jax.random.split(key, 3)

    x = jax.random.normal(k_x, (N, C_IN, H, W), dtype=jnp.float32)
    # nn.Conv2d(kernel_size=1) parameters: weight (C_out, C_in, 1, 1), bias (C_out,).
    weight = jax.random.normal(k_w, (C_OUT, C_IN, 1, 1), dtype=jnp.float32) * 0.1
    bias = jax.random.normal(k_b, (C_OUT,), dtype=jnp.float32) * 0.1

    y = jax.block_until_ready(conv1x1(x, weight, bias))

    # Reference check against plain JAX (same math as nn.Conv2d kernel_size=1).
    y_ref = (jnp.einsum("nchw,oc->nohw", x, weight.reshape(C_OUT, C_IN))
             + bias[None, :, None, None])
    assert y.shape == (N, C_OUT, H, W)
    assert jnp.allclose(y, y_ref, atol=1e-5, rtol=1e-5)

    print("KERNEL_OK")
</pallas_src>

<mosaic_0001>
module attributes {stable_mosaic.version = 11 : i64} {
  func.func @_conv1x1_kernel(%arg0: i32, %arg1: i32, %arg2: memref<1x4x256xf32, #tpu.memory_space<vmem>>, %arg3: memref<8x4xf32, #tpu.memory_space<vmem>>, %arg4: memref<8x1xf32, #tpu.memory_space<vmem>>, %arg5: memref<1x8x256xf32, #tpu.memory_space<vmem>>) attributes {dimension_semantics = [#tpu.dimension_semantics<parallel>, #tpu.dimension_semantics<parallel>], iteration_bounds = array<i64: 2, 1>, scalar_prefetch = 0 : i64, scratch_operands = 0 : i64, tpu.core_type = #tpu.core_type<tc>, window_params = [{transform_indices = @transform_0, window_bounds = array<i64: 1, 4, 256>}, {pipeline_mode = #tpu.pipeline_mode<synchronous>, transform_indices = @transform_1, window_bounds = array<i64: 8, 4>}, {pipeline_mode = #tpu.pipeline_mode<synchronous>, transform_indices = @transform_2, window_bounds = array<i64: 8, 1>}, {transform_indices = @transform_3, window_bounds = array<i64: 1, 8, 256>}]} {
    %c0 = arith.constant 0 : index
    %c0_0 = arith.constant 0 : index
    %0 = vector.load %arg3[%c0, %c0_0] : memref<8x4xf32, #tpu.memory_space<vmem>>, vector<8x4xf32>
    %c0_1 = arith.constant 0 : index
    %c0_2 = arith.constant 0 : index
    %1 = vector.load %arg4[%c0_1, %c0_2] : memref<8x1xf32, #tpu.memory_space<vmem>>, vector<8x1xf32>
    %c0_3 = arith.constant 0 : index
    %c0_4 = arith.constant 0 : index
    %c0_5 = arith.constant 0 : index
    %2 = vector.load %arg2[%c0_3, %c0_4, %c0_5] : memref<1x4x256xf32, #tpu.memory_space<vmem>>, vector<1x4x256xf32>
    %3 = vector.shape_cast %2 : vector<1x4x256xf32> to vector<4x256xf32>
    %cst = arith.constant dense<0.000000e+00> : vector<8x256xf32>
    %4 = tpu.matmul %0, %3, %cst {dimension_numbers = #tpu.dot_dimension_numbers<[1], [0], [0], [1], [0, 0, 1, 1], [], []>} : vector<8x4xf32>, vector<4x256xf32>, vector<8x256xf32> -> vector<8x256xf32>
    %5 = vector.broadcast %1 : vector<8x1xf32> to vector<8x256xf32>
    %6 = arith.addf %4, %5 : vector<8x256xf32>
    %c0_6 = arith.constant 0 : index
    %c0_7 = arith.constant 0 : index
    %c0_8 = arith.constant 0 : index
    %7 = vector.load %arg5[%c0_6, %c0_7, %c0_8] : memref<1x8x256xf32, #tpu.memory_space<vmem>>, vector<1x8x256xf32>
    %8 = vector.shape_cast %7 : vector<1x8x256xf32> to vector<8x256xf32>
    %9 = vector.shape_cast %6 : vector<8x256xf32> to vector<1x8x256xf32>
    tpu.vector_store %arg5[%c0_6, %c0_7, %c0_8], %9 {strides = array<i32>} : memref<1x8x256xf32, #tpu.memory_space<vmem>>, vector<1x8x256xf32>,
    return
  }
  func.func @transform_0(%arg0: i32, %arg1: i32) -> (i32, i32, i32) {
    %c0_i32 = arith.constant 0 : i32
    %c0_i32_0 = arith.constant 0 : i32
    return %arg0, %c0_i32, %arg1 : i32, i32, i32
  }
  func.func @transform_1(%arg0: i32, %arg1: i32) -> (i32, i32) {
    %c0_i32 = arith.constant 0 : i32
    %c0_i32_0 = arith.constant 0 : i32
    %c0_i32_1 = arith.constant 0 : i32
    return %c0_i32, %c0_i32_0 : i32, i32
  }
  func.func @transform_2(%arg0: i32, %arg1: i32) -> (i32, i32) {
    %c0_i32 = arith.constant 0 : i32
    %c0_i32_0 = arith.constant 0 : i32
    %c0_i32_1 = arith.constant 0 : i32
    return %c0_i32, %c0_i32_0 : i32, i32
  }
  func.func @transform_3(%arg0: i32, %arg1: i32) -> (i32, i32, i32) {
    %c0_i32 = arith.constant 0 : i32
    %c0_i32_0 = arith.constant 0 : i32
    return %arg0, %c0_i32, %arg1 : i32, i32, i32
  }
}

</mosaic_0001>

<bundles_post_ra>
// kernel: conv1x1.1
= control target key start
LH: loop header
LB: loop body
LE: loop exit
PB: predicated region body
PF: predicated region fallthrough
CT: control target
= control target key end

     0   :  { %s479_s12 = smov 0   ;;  %s481_s13 = smov 0   ;;  %s518_s0 = inlined_call_operand.vmem [shape: f32[2,4,256], index: 0, kind: input, shape index: {}]   ;;  %s519_s1 = inlined_call_operand.vmem [shape: f32[8,4], index: 1, kind: input, shape index: {}]   ;;  %s520_s2 = inlined_call_operand.vmem [shape: f32[8,1], index: 2, kind: input, shape index: {}]   ;;  %s521_s3 = inlined_call_operand.vmem [shape: f32[2,8,256], index: 3, kind: output, shape index: {}]  }
   0x1   :  { %s483_s14 = smov 0  }
   0x2 LB: > { %s25_s15 = sadd.s32 1, %s451_s13  ;;  %p393_p0 = scmp.ge.s32.totalorder %s455_s14, 1  ;;  %s455_s14 = sphi %s483_s14, %s13_s14   ;;  %s451_s13 = sphi %s481_s13, %s523_s13   ;;  %s447_s12 = sphi %s479_s12, %s522_s12  }
   0x3   : > { %p27_p1 = scmp.ge.s32.totalorder %s25_s15, 2  ;;  %p158_p2 = scmp.lt.s32.totalorder %s455_s14, 3 }
   0x5   : > { %s525_s15 = smov (%p27_p1, %s25_s15), 0  ;;  %p159_p3 = pnand %p393_p0, %p158_p2 }
   0x6   : > { %p191_p4 = scmp.lt.s32.totalorder (!%p159_p3), %s447_s12, 1  ;;  %v457_v0 = vmov (!%p159_p3), 0.0   ;;  %v458_v1 = vmov (!%p159_p3), 0   ;;  %v211_v2 = vld [vmem:[%s520_s2] sm:$0xff] (!%p159_p3)  ;;  %vm224_vm0 = vcmask (!%p159_p3), 1043456   ;;  %vm220_vm1 = vcmask (!%p159_p3), 31744  }
   0x7   : > { %162 = sbr.rel (%p159_p3) target bundleno = 238 (0xee), region = 32  ;;  %293 = vmatprep.mubr.f32.mxu0 (!%p159_p3), %v457_v0  ;;  %431 = vset.pattern.permute.xlu0 (!%p159_p3), %v458_v1  ;;  %v210_v5 = vld [vmem:[%s519_s1] sm:$0xff] (!%p159_p3) }
   0x8   : > { %215 = vperm.xlu0 (!%p159_p3), %431, %v211_v2  }
   0xe   : > { %s527_s12 = smov (!%p191_p4, %s447_s12), 1 }
   0xf   : > { %s403_s18 = sshll.u32 %s527_s12, 3  ;;  %s404_s24 = sshll.u32 %s527_s12, 4 }
  0x10   : > { %s198_s21 = scalar_lea.vmem %s518_s0, %s403_s18  ;;  %s208_s27 = scalar_lea.vmem %s521_s3, %s404_s24 }
  0x11   : > { %v212_v3 = vld [vmem:[%s198_s21] sm:$0xff] }
  0x12   : > { %v219_v4 = vcombine.high %v212_v3, %v212_v3 }
  0x14   : > { %398 = vmatprep.subr.msk.mxu0 %vm224_vm0, %v219_v4 }
  0x15   : > { %399 = vmatpush1.msk.msra.mxu0 %vm224_vm0, %v212_v3 }
  0x16   : > { %400 = vmatmul.mubr.msk.f32.vlgmr.msra.gmra.mrb[0].mxu0 %vm220_vm1, %v210_v5 }
  0x87   : > { %v216_v6 = vpop.permute.xlu0 %215 }
  0xe9   : > { %v295_v7 = vpop.f32.mrb[0].mxu0 }
  0xea   : > { %v296_v8 = vadd.f32 %v295_v7, %v216_v6  ;;  %v297_v9 = vpop.f32.mrb[1].mxu0 }
  0xeb   : > { %v298_v10 = vadd.f32 %v297_v9, %v216_v6 }
  0xec   : > { %300 = vst [vmem:[%s208_s27] sm:$0xff] %v296_v8 }
  0xed   : > { %301 = vst [vmem:[%s208_s27 + $0x8] sm:$0xff] %v298_v10 }
  0xee PF: > { %s13_s14 = sadd.s32 1, %s455_s14   ;;  %s522_s12 = smov %s451_s13 }
  0xef   : > { %p10_p5 = scmp.ge.s32.totalorder %s13_s14, 4   ;;  %s523_s13 = smov %s525_s15 }
  0xf1   :  { %12 = sbr.rel (!%p10_p5) target bundleno = 2 (0x2), region = 62 }

</bundles_post_ra>
